<compile_context>
chip_gen: v6e
topology: v6e:2x2x1
jax: 0.10.0
libtpu: 0.0.40
codegen_flags: <defaults>
</compile_context>

<pallas_src>
import jax
import jax.numpy as jnp
from jax import lax
from jax.experimental import pallas as pl
from jax.experimental.pallas import tpu as pltpu

EPS = 1e-5
# bf16 MXU operands with f32 accumulation. Set to jnp.float32 for bit-tighter
# accuracy at the cost of MXU throughput / HBM bytes.
MXU_DTYPE = jnp.bfloat16


def _round_up(x, n):
    return (x + n - 1) // n * n


# ---------------------------------------------------------------------------
# Kernel 1: one conv-stage tile as a fat GEMM + per-tile BN partial statistics.
#   w_ref : (Cout, Kp)   bf16   GEMM weights (K = 9*Cin, zero-padded to Kp)
#   b_ref : (Cout, 1)    f32    conv bias
#   p_ref : (Kp, TM)     bf16   im2col patch tile (TM columns out of N*H*W)
#   z_ref : (Cout, TM)   f32    pre-BN conv output tile (lane-dense)
#   s_ref : (1, Cout, 1) f32    per-tile  sum_m z      (BN partial stats)
#   q_ref : (1, Cout, 1) f32    per-tile  sum_m z^2
# ---------------------------------------------------------------------------
def conv_stats_kernel(w_ref, b_ref, p_ref, z_ref, s_ref, q_ref):
    z = jnp.dot(w_ref[...], p_ref[...], preferred_element_type=jnp.float32)
    z = z + b_ref[...]                               # (Cout, TM) + (Cout, 1)
    z_ref[...] = z
    s_ref[...] = jnp.sum(z, axis=1, keepdims=True)[None]
    q_ref[...] = jnp.sum(z * z, axis=1, keepdims=True)[None]


# Kernel 2: fused BatchNorm affine (precomputed per-channel scale/shift) + ReLU.
def bn_relu_kernel(scale_ref, shift_ref, z_ref, y_ref):
    y_ref[...] = jnp.maximum(z_ref[...] * scale_ref[...] + shift_ref[...], 0.0)


# ---------------------------------------------------------------------------
# Wrapper helpers (XLA glue: layout plumbing + tiny per-channel scalar math)
# ---------------------------------------------------------------------------
def _pick_tile(m):
    """Largest lane-dense tile (multiple of 128) dividing m = N*H*W.
    Keep >= 2 tiles when possible so the 'parallel' grid axis can shard
    across v7x's two TensorCores."""
    tm = m
    for cand in (2048, 1024, 512, 256, 128):
        if m % cand == 0:
            tm = cand
            break
    if tm == m and m % 256 == 0:
        tm = m // 2
    return tm


def _im2col(x_nchw, kp):
    """(N, C, H, W) -> (Kp, N*H*W) patch matrix for a 3x3 / pad=1 conv.
    Row index k = (dy*3 + dx)*C + c; column index m = n*H*W + h*W + w.
    Rows [9*C, Kp) are zero padding (exact).  Done in the wrapper so no
    shifted-window relayouts happen inside kernels."""
    n, c, h, w = x_nchw.shape
    xp = jnp.pad(x_nchw, ((0, 0), (0, 0), (1, 1), (1, 1)))
    cols = [xp[:, :, dy:dy + h, dx:dx + w] for dy in range(3) for dx in range(3)]
    p = jnp.stack(cols, axis=0)                # (9, N, C, H, W)
    p = jnp.transpose(p, (0, 2, 1, 3, 4))      # (9, C, N, H, W)
    p = p.reshape(9 * c, n * h * w).astype(MXU_DTYPE)
    return jnp.pad(p, ((0, kp - 9 * c), (0, 0)))


def _reshape_weight(w_oihw, kp):
    """PyTorch OIHW -> (Cout, Kp) GEMM weights with k = (dy*3+dx)*C + c."""
    cout, cin = w_oihw.shape[0], w_oihw.shape[1]
    wr = jnp.transpose(w_oihw, (0, 2, 3, 1)).reshape(cout, 9 * cin)
    wr = wr.astype(MXU_DTYPE)
    return jnp.pad(wr, ((0, 0), (0, kp - 9 * cin)))


def _fold_bn(sum_z, sumsq_z, count, gamma, beta):
    """Fold BN (batch mean, biased variance) + affine into scale/shift."""
    mean = sum_z / count
    var = sumsq_z / count - mean * mean
    scale = gamma * lax.rsqrt(var + EPS)
    shift = beta - mean * scale
    return scale, shift


def _conv_stage(patches, w_r, bias, *, tm):
    """z = w_r @ patches + bias, tiled over columns, plus per-tile sum/sumsq."""
    kp, m = patches.shape
    cout = w_r.shape[0]
    g = m // tm

    itm = patches.dtype.itemsize
    step_bytes = (cout * kp * w_r.dtype.itemsize + cout * 4
                  + kp * tm * itm + cout * tm * 4 + 2 * cout * 4)
    # double-buffered pipeline stages + headroom; clamp under v7x's 64 MiB/TC
    vmem_limit = int(min(max(2 * step_bytes + (4 << 20), 8 << 20), 48 << 20))

    cost = pl.CostEstimate(
        flops=2 * cout * kp * m + cout * m,
        transcendentals=0,
        bytes_accessed=int(patches.size * itm + w_r.size * w_r.dtype.itemsize
                           + cout * m * 4 + 2 * g * cout * 4))

    z, s, q = pl.pallas_call(
        conv_stats_kernel,
        out_shape=(jax.ShapeDtypeStruct((cout, m), jnp.float32),
                   jax.ShapeDtypeStruct((g, cout, 1), jnp.float32),
                   jax.ShapeDtypeStruct((g, cout, 1), jnp.float32)),
        grid=(g,),
        in_specs=[pl.BlockSpec((cout, kp), lambda i: (0, 0)),
                  pl.BlockSpec((cout, 1), lambda i: (0, 0)),
                  pl.BlockSpec((kp, tm), lambda i: (0, i))],
        out_specs=(pl.BlockSpec((cout, tm), lambda i: (0, i)),
                   pl.BlockSpec((1, cout, 1), lambda i: (i, 0, 0)),
                   pl.BlockSpec((1, cout, 1), lambda i: (i, 0, 0))),
        compiler_params=pltpu.CompilerParams(
            dimension_semantics=("parallel",),
            vmem_limit_bytes=vmem_limit),
        cost_estimate=cost,
    )(w_r, bias, patches)

    return z, jnp.sum(s, axis=0)[:, 0], jnp.sum(q, axis=0)[:, 0]


def _bn_relu_stage(z, scale, shift, *, tm):
    cout, m = z.shape
    g = m // tm
    vmem_limit = int(min(max(4 * cout * tm * 4 + (4 << 20), 8 << 20), 48 << 20))
    cost = pl.CostEstimate(flops=3 * cout * m, transcendentals=0,
                           bytes_accessed=2 * cout * m * 4)
    return pl.pallas_call(
        bn_relu_kernel,
        out_shape=jax.ShapeDtypeStruct((cout, m), jnp.float32),
        grid=(g,),
        in_specs=[pl.BlockSpec((cout, 1), lambda i: (0, 0)),
                  pl.BlockSpec((cout, 1), lambda i: (0, 0)),
                  pl.BlockSpec((cout, tm), lambda i: (0, i))],
        out_specs=pl.BlockSpec((cout, tm), lambda i: (0, i)),
        compiler_params=pltpu.CompilerParams(
            dimension_semantics=("parallel",),
            vmem_limit_bytes=vmem_limit),
        cost_estimate=cost,
    )(scale.reshape(cout, 1), shift.reshape(cout, 1), z)


def double_conv(x_nchw, params):
    """x_nchw: (N, Cin, H, W) f32. Returns (N, Cout, H, W) f32."""
    w1, b1, g1, be1, w2, b2, g2, be2 = params
    n, cin, h, w = x_nchw.shape
    cout = w1.shape[0]
    m = n * h * w
    tm = _pick_tile(m)

    kp1 = _round_up(9 * cin, 128)
    kp2 = _round_up(9 * cout, 128)
    w1r = _reshape_weight(w1, kp1)
    w2r = _reshape_weight(w2, kp2)

    # ---- stage 1: conv1 (+ BN1 partial stats) -> fused BN1 affine + ReLU ----
    p1 = _im2col(x_nchw, kp1)
    z1, s1, q1 = _conv_stage(p1, w1r, b1.astype(jnp.float32).reshape(cout, 1), tm=tm)
    scale1, shift1 = _fold_bn(s1, q1, m, g1, be1)
    y1 = _bn_relu_stage(z1, scale1, shift1, tm=tm)            # (Cout, N*H*W)

    # ---- stage 2: conv2 (+ BN2 partial stats) -> fused BN2 affine + ReLU ----
    y1_nchw = jnp.transpose(y1.reshape(cout, n, h, w), (1, 0, 2, 3))
    p2 = _im2col(y1_nchw, kp2)
    z2, s2, q2 = _conv_stage(p2, w2r, b2.astype(jnp.float32).reshape(cout, 1), tm=tm)
    scale2, shift2 = _fold_bn(s2, q2, m, g2, be2)
    y2 = _bn_relu_stage(z2, scale2, shift2, tm=tm)            # (Cout, N*H*W)

    return jnp.transpose(y2.reshape(cout, n, h, w), (1, 0, 2, 3))


# ---------------------------------------------------------------------------
# Pure-JAX reference (NCHW), mirrors the PyTorch training-mode forward.
# ---------------------------------------------------------------------------
def ref_double_conv(x, params):
    w1, b1, g1, be1, w2, b2, g2, be2 = params

    def conv(x, w, b):
        y = lax.conv_general_dilated(
            x, w, window_strides=(1, 1), padding=((1, 1), (1, 1)),
            dimension_numbers=('NCHW', 'OIHW', 'NCHW'))
        return y + b[None, :, None, None]

    def bn_relu(y, g, be):
        mu = jnp.mean(y, axis=(0, 2, 3), keepdims=True)
        var = jnp.mean((y - mu) ** 2, axis=(0, 2, 3), keepdims=True)
        y = (y - mu) / jnp.sqrt(var + EPS)
        y = y * g[None, :, None, None] + be[None, :, None, None]
        return jnp.maximum(y, 0.0)

    y = bn_relu(conv(x, w1, b1), g1, be1)
    return bn_relu(conv(y, w2, b2), g2, be2)


if __name__ == "__main__":
    key = jax.random.PRNGKey(0)
    N, Cin, Cout, H, W = 2, 4, 8, 16, 16

    keys = jax.random.split(key, 9)
    x = jax.random.normal(keys[0], (N, Cin, H, W), jnp.float32)
    w1 = jax.random.normal(keys[1], (Cout, Cin, 3, 3), jnp.float32) * 0.1
    b1 = jax.random.normal(keys[2], (Cout,), jnp.float32) * 0.1
    g1 = 1.0 + 0.1 * jax.random.normal(keys[3], (Cout,), jnp.float32)
    be1 = 0.1 * jax.random.normal(keys[4], (Cout,), jnp.float32)
    w2 = jax.random.normal(keys[5], (Cout, Cout, 3, 3), jnp.float32) * 0.1
    b2 = jax.random.normal(keys[6], (Cout,), jnp.float32) * 0.1
    g2 = 1.0 + 0.1 * jax.random.normal(keys[7], (Cout,), jnp.float32)
    be2 = 0.1 * jax.random.normal(keys[8], (Cout,), jnp.float32)
    params = (w1, b1, g1, be1, w2, b2, g2, be2)

    out = jax.block_until_ready(jax.jit(double_conv)(x, params))
    ref = jax.block_until_ready(ref_double_conv(x, params))

    assert out.shape == (N, Cout, H, W), out.shape
    err_max = float(jnp.max(jnp.abs(out - ref)))
    err_mean = float(jnp.mean(jnp.abs(out - ref)))
    # bf16 MXU operands (f32 accumulation, f32 BN statistics) give a small,
    # expected drift vs the pure-f32 reference; outputs are O(1) after BN.
    assert err_mean < 3e-2, ("mean abs err", err_mean)
    assert err_max < 2e-1, ("max abs err", err_max)
    print("KERNEL_OK")
</pallas_src>

<mosaic_0001>
module attributes {stable_mosaic.version = 11 : i64} {
  func.func @conv_stats_kernel(%arg0: i32, %arg1: memref<8x128xbf16, #tpu.memory_space<vmem>>, %arg2: memref<8x1xf32, #tpu.memory_space<vmem>>, %arg3: memref<128x256xbf16, #tpu.memory_space<vmem>>, %arg4: memref<8x256xf32, #tpu.memory_space<vmem>>, %arg5: memref<1x8x1xf32, #tpu.memory_space<vmem>>, %arg6: memref<1x8x1xf32, #tpu.memory_space<vmem>>) attributes {dimension_semantics = [#tpu.dimension_semantics<parallel>], iteration_bounds = array<i64: 2>, scalar_prefetch = 0 : i64, scratch_operands = 0 : i64, tpu.core_type = #tpu.core_type<tc>, window_params = [{pipeline_mode = #tpu.pipeline_mode<synchronous>, transform_indices = @transform_0, window_bounds = array<i64: 8, 128>}, {pipeline_mode = #tpu.pipeline_mode<synchronous>, transform_indices = @transform_1, window_bounds = array<i64: 8, 1>}, {transform_indices = @transform_2, window_bounds = array<i64: 128, 256>}, {transform_indices = @transform_3, window_bounds = array<i64: 8, 256>}, {transform_indices = @transform_4, window_bounds = array<i64: 1, 8, 1>}, {transform_indices = @transform_5, window_bounds = array<i64: 1, 8, 1>}]} {
    %c0 = arith.constant 0 : index
    %c0_0 = arith.constant 0 : index
    %0 = vector.load %arg1[%c0, %c0_0] : memref<8x128xbf16, #tpu.memory_space<vmem>>, vector<8x128xbf16>
    %c0_1 = arith.constant 0 : index
    %c0_2 = arith.constant 0 : index
    %1 = vector.load %arg3[%c0_1, %c0_2] : memref<128x256xbf16, #tpu.memory_space<vmem>>, vector<128x256xbf16>
    %cst = arith.constant dense<0.000000e+00> : vector<8x256xf32>
    %2 = tpu.matmul %0, %1, %cst {dimension_numbers = #tpu.dot_dimension_numbers<[1], [0], [0], [1], [0, 0, 1, 1], [], []>} : vector<8x128xbf16>, vector<128x256xbf16>, vector<8x256xf32> -> vector<8x256xf32>
    %c0_3 = arith.constant 0 : index
    %c0_4 = arith.constant 0 : index
    %3 = vector.load %arg2[%c0_3, %c0_4] : memref<8x1xf32, #tpu.memory_space<vmem>>, vector<8x1xf32>
    %4 = vector.broadcast %3 : vector<8x1xf32> to vector<8x256xf32>
    %5 = arith.addf %2, %4 : vector<8x256xf32>
    %c0_5 = arith.constant 0 : index
    %c0_6 = arith.constant 0 : index
    %6 = vector.load %arg4[%c0_5, %c0_6] : memref<8x256xf32, #tpu.memory_space<vmem>>, vector<8x256xf32>
    tpu.vector_store %arg4[%c0_5, %c0_6], %5 {strides = array<i32>} : memref<8x256xf32, #tpu.memory_space<vmem>>, vector<8x256xf32>,
    %cst_7 = arith.constant dense<0.000000e+00> : vector<8xf32>
    %7 = vector.multi_reduction <add>, %5, %cst_7 [1] : vector<8x256xf32> to vector<8xf32>
    %8 = vector.shape_cast %7 : vector<8xf32> to vector<8x1xf32>
    %9 = vector.shape_cast %8 : vector<8x1xf32> to vector<1x8x1xf32>
    %c0_8 = arith.constant 0 : index
    %c0_9 = arith.constant 0 : index
    %c0_10 = arith.constant 0 : index
    %10 = vector.load %arg5[%c0_8, %c0_9, %c0_10] : memref<1x8x1xf32, #tpu.memory_space<vmem>>, vector<1x8x1xf32>
    tpu.vector_store %arg5[%c0_8, %c0_9, %c0_10], %9 {strides = array<i32>} : memref<1x8x1xf32, #tpu.memory_space<vmem>>, vector<1x8x1xf32>,
    %11 = arith.mulf %5, %5 : vector<8x256xf32>
    %cst_11 = arith.constant dense<0.000000e+00> : vector<8xf32>
    %12 = vector.multi_reduction <add>, %11, %cst_11 [1] : vector<8x256xf32> to vector<8xf32>
    %13 = vector.shape_cast %12 : vector<8xf32> to vector<8x1xf32>
    %14 = vector.shape_cast %13 : vector<8x1xf32> to vector<1x8x1xf32>
    %c0_12 = arith.constant 0 : index
    %c0_13 = arith.constant 0 : index
    %c0_14 = arith.constant 0 : index
    %15 = vector.load %arg6[%c0_12, %c0_13, %c0_14] : memref<1x8x1xf32, #tpu.memory_space<vmem>>, vector<1x8x1xf32>
    tpu.vector_store %arg6[%c0_12, %c0_13, %c0_14], %14 {strides = array<i32>} : memref<1x8x1xf32, #tpu.memory_space<vmem>>, vector<1x8x1xf32>,
    return
  }
  func.func @transform_0(%arg0: i32) -> (i32, i32) {
    %c0_i32 = arith.constant 0 : i32
    %c0_i32_0 = arith.constant 0 : i32
    %c0_i32_1 = arith.constant 0 : i32
    return %c0_i32, %c0_i32_0 : i32, i32
  }
  func.func @transform_1(%arg0: i32) -> (i32, i32) {
    %c0_i32 = arith.constant 0 : i32
    %c0_i32_0 = arith.constant 0 : i32
    %c0_i32_1 = arith.constant 0 : i32
    return %c0_i32, %c0_i32_0 : i32, i32
  }
  func.func @transform_2(%arg0: i32) -> (i32, i32) {
    %c0_i32 = arith.constant 0 : i32
    %c0_i32_0 = arith.constant 0 : i32
    return %c0_i32, %arg0 : i32, i32
  }
  func.func @transform_3(%arg0: i32) -> (i32, i32) {
    %c0_i32 = arith.constant 0 : i32
    %c0_i32_0 = arith.constant 0 : i32
    return %c0_i32, %arg0 : i32, i32
  }
  func.func @transform_4(%arg0: i32) -> (i32, i32, i32) {
    %c0_i32 = arith.constant 0 : i32
    %c0_i32_0 = arith.constant 0 : i32
    %c0_i32_1 = arith.constant 0 : i32
    return %arg0, %c0_i32, %c0_i32_0 : i32, i32, i32
  }
  func.func @transform_5(%arg0: i32) -> (i32, i32, i32) {
    %c0_i32 = arith.constant 0 : i32
    %c0_i32_0 = arith.constant 0 : i32
    %c0_i32_1 = arith.constant 0 : i32
    return %arg0, %c0_i32, %c0_i32_0 : i32, i32, i32
  }
}

module attributes {stable_mosaic.version = 11 : i64} {
  func.func @bn_relu_kernel(%arg0: i32, %arg1: memref<8x1xf32, #tpu.memory_space<vmem>>, %arg2: memref<8x1xf32, #tpu.memory_space<vmem>>, %arg3: memref<8x256xf32, #tpu.memory_space<vmem>>, %arg4: memref<8x256xf32, #tpu.memory_space<vmem>>) attributes {dimension_semantics = [#tpu.dimension_semantics<parallel>], iteration_bounds = array<i64: 2>, scalar_prefetch = 0 : i64, scratch_operands = 0 : i64, tpu.core_type = #tpu.core_type<tc>, window_params = [{pipeline_mode = #tpu.pipeline_mode<synchronous>, transform_indices = @transform_0, window_bounds = array<i64: 8, 1>}, {pipeline_mode = #tpu.pipeline_mode<synchronous>, transform_indices = @transform_1, window_bounds = array<i64: 8, 1>}, {transform_indices = @transform_2, window_bounds = array<i64: 8, 256>}, {transform_indices = @transform_3, window_bounds = array<i64: 8, 256>}]} {
    %c0 = arith.constant 0 : index
    %c0_0 = arith.constant 0 : index
    %0 = vector.load %arg3[%c0, %c0_0] : memref<8x256xf32, #tpu.memory_space<vmem>>, vector<8x256xf32>
    %c0_1 = arith.constant 0 : index
    %c0_2 = arith.constant 0 : index
    %1 = vector.load %arg1[%c0_1, %c0_2] : memref<8x1xf32, #tpu.memory_space<vmem>>, vector<8x1xf32>
    %2 = vector.broadcast %1 : vector<8x1xf32> to vector<8x256xf32>
    %3 = arith.mulf %0, %2 : vector<8x256xf32>
    %c0_3 = arith.constant 0 : index
    %c0_4 = arith.constant 0 : index
    %4 = vector.load %arg2[%c0_3, %c0_4] : memref<8x1xf32, #tpu.memory_space<vmem>>, vector<8x1xf32>
    %5 = vector.broadcast %4 : vector<8x1xf32> to vector<8x256xf32>
    %6 = arith.addf %3, %5 : vector<8x256xf32>
    %cst = arith.constant 0.000000e+00 : f32
    %7 = vector.broadcast %cst : f32 to vector<8x256xf32>
    %8 = arith.maximumf %6, %7 : vector<8x256xf32>
    %c0_5 = arith.constant 0 : index
    %c0_6 = arith.constant 0 : index
    %9 = vector.load %arg4[%c0_5, %c0_6] : memref<8x256xf32, #tpu.memory_space<vmem>>, vector<8x256xf32>
    tpu.vector_store %arg4[%c0_5, %c0_6], %8 {strides = array<i32>} : memref<8x256xf32, #tpu.memory_space<vmem>>, vector<8x256xf32>,
    return
  }
  func.func @transform_0(%arg0: i32) -> (i32, i32) {
    %c0_i32 = arith.constant 0 : i32
    %c0_i32_0 = arith.constant 0 : i32
    %c0_i32_1 = arith.constant 0 : i32
    return %c0_i32, %c0_i32_0 : i32, i32
  }
  func.func @transform_1(%arg0: i32) -> (i32, i32) {
    %c0_i32 = arith.constant 0 : i32
    %c0_i32_0 = arith.constant 0 : i32
    %c0_i32_1 = arith.constant 0 : i32
    return %c0_i32, %c0_i32_0 : i32, i32
  }
  func.func @transform_2(%arg0: i32) -> (i32, i32) {
    %c0_i32 = arith.constant 0 : i32
    %c0_i32_0 = arith.constant 0 : i32
    return %c0_i32, %arg0 : i32, i32
  }
  func.func @transform_3(%arg0: i32) -> (i32, i32) {
    %c0_i32 = arith.constant 0 : i32
    %c0_i32_0 = arith.constant 0 : i32
    return %c0_i32, %arg0 : i32, i32
  }
}

</mosaic_0001>

<bundles_post_ra>
// kernel: double_conv.5
= control target key start
LH: loop header
LB: loop body
LE: loop exit
PB: predicated region body
PF: predicated region fallthrough
CT: control target
= control target key end

     0   :  { %s302_s12 = smov 0   ;;  %s325_s0 = inlined_call_operand.vmem [shape: f32[8,1], index: 0, kind: input, shape index: {}]   ;;  %s326_s1 = inlined_call_operand.vmem [shape: f32[8,1], index: 1, kind: input, shape index: {}]   ;;  %s327_s2 = inlined_call_operand.vmem [shape: f32[8,512], index: 2, kind: input, shape index: {}]   ;;  %s328_s3 = inlined_call_operand.vmem [shape: f32[8,512], index: 3, kind: output, shape index: {}]  }
   0x1 LB: > { %s252_s13 = sadd.s32 4294967295, %s279_s12   ;;  %p256_p0 = scmp.ge.s32.totalorder %s279_s12, 1  ;;  %s279_s12 = sphi %s302_s12, %s13_s12  }
   0x2   : > { %p138_p1 = scmp.lt.s32.totalorder %s279_s12, 3 }
   0x4   : > { %p139_p2 = pnand %p256_p0, %p138_p1 }
   0x5   : > { %s257_s18 = sshll.u32 (!%p139_p2), %s252_s13, 1 }
   0x6   : > { %142 = sbr.rel (%p139_p2) target bundleno = 146 (0x92), region = 32  ;;  %p163_p3 = scmp.lt.s32.totalorder (!%p139_p2), %s257_s18, 3 }
   0xb   : > { %v176_v0 = vld [vmem:[%s325_s0] sm:$0xff]  ;;  %v281_v1 = vmov 0   ;;  %s330_s18 = smov (!%p163_p3, %s257_s18), 3 }
   0xc   : > { %272 = vset.pattern.permute.xlu0 %v281_v1  ;;  %v184_v2 = vld [vmem:[%s326_s1] sm:$0xff]  ;;  %s258_s19 = sshll.u32 %s330_s18, 3 }
   0xd   : > { %179 = vperm.xlu0 %272, %v176_v0   ;;  %s166_s22 = scalar_lea.vmem %s327_s2, %s258_s19  ;;  %s172_s25 = scalar_lea.vmem %s328_s3, %s258_s19 }
   0xe   : > { %v174_v4 = vld [vmem:[%s166_s22] sm:$0xff]  ;;  %v175_v5 = vld [vmem:[%s166_s22 + $0x8] sm:$0xff] }
  0x11   : > { %187 = vperm.xlu0 %272, %v184_v2  }
  0x88   : > { %v180_v3 = vpop.permute.xlu0 %179 }
  0x89   : > { %v182_v6 = vmul.f32 %v180_v3, %v174_v4  ;;  %v183_v7 = vmul.f32 %v180_v3, %v175_v5 }
  0x8c   : > { %v188_v8 = vpop.permute.xlu0 %187 }
  0x8d   : > { %v190_v9 = vadd.f32 %v188_v8, %v182_v6  ;;  %v191_v10 = vadd.f32 %v188_v8, %v183_v7 }
  0x8f   : > { %v192_v11 = vmax.f32 %v190_v9, 0.0  ;;  %v193_v12 = vmax.f32 %v191_v10, 0.0 }
  0x91   : > { %194 = vst [vmem:[%s172_s25] sm:$0xff] %v192_v11  ;;  %195 = vst [vmem:[%s172_s25 + $0x8] sm:$0xff] %v193_v12 }
  0x92 PF: > { %s13_s12 = sadd.s32 1, %s279_s12  }
  0x93   : > { %p10_p4 = scmp.ge.s32.totalorder %s13_s12, 4  }
  0x95   :  { %12 = sbr.rel (!%p10_p4) target bundleno = 1 (0x1), region = 62 }

// kernel: double_conv.4
= control target key start
LH: loop header
LB: loop body
LE: loop exit
PB: predicated region body
PF: predicated region fallthrough
CT: control target
= control target key end

     0   :  { %s763_s18 = smov 0   ;;  %s765_s19 = smov 0   ;;  %s848_s0 = inlined_call_operand.vmem [shape: bf16[8,128], index: 0, kind: input, shape index: {}]   ;;  %s849_s1 = inlined_call_operand.vmem [shape: f32[8,1], index: 1, kind: input, shape index: {}]   ;;  %s850_s2 = inlined_call_operand.vmem [shape: bf16[128,512], index: 2, kind: input, shape index: {}]   ;;  %s851_s3 = inlined_call_operand.vmem [shape: f32[8,512], index: 3, kind: output, shape index: {0}]   ;;  %s852_s4 = inlined_call_operand.vmem [shape: f32[2,8,1], index: 4, kind: output, shape index: {1}]   ;;  %s853_s5 = inlined_call_operand.vmem [shape: f32[2,8,1], index: 5, kind: output, shape index: {2}]  }
   0x1   :  { %s767_s20 = smov 0  }
   0x2 LB: > { %s779_s21 = sadd.s32 4294967295, %s730_s20   ;;  %s782_s22 = sadd.s32 1, %s730_s20   ;;  %s730_s20 = sphi %s767_s20, %s856_s20   ;;  %s726_s19 = sphi %s765_s19, %s855_s19   ;;  %s722_s18 = sphi %s763_s18, %s854_s18  }
   0x3   : > { %s62_s23 = ssub.s32 %s730_s20, %s782_s22  ;;  %s65_s24 = sadd.s32 1, %s726_s19 }
   0x4   : > { %p63_p0 = scmp.eq.s32.totalorder %s62_s23, 0  ;;  %p72_p1 = scmp.ne.s32.totalorder %s726_s19, %s722_s18 }
   0x5   : > { %p73_p2 = scmp.eq.s32.totalorder %s730_s20, 0  ;;  %p629_p4 = scmp.ge.s32.totalorder %s730_s20, 2 }
   0x6   : > { %s791_s25 = scalar_select %p63_p0, %s726_s19, %s65_s24  }
   0x7   : > { %p74_p3 = por %p73_p2, %p72_p1  ;;  %182 = sbr.rel (%p629_p4) target bundleno = 24 (0x18), region = 24 }
   0xc   : > { %185 = sbr.rel (!%p74_p3) target bundleno = 24 (0x18), region = 28  ;;  %s187_s26 = sand.u32 (%p74_p3), 1, %s726_s19  }
   0xd   : > { %s657_s27 = sshll.u32 (%p74_p3), %s730_s20, 3  ;;  %s630_s28 = sshll.u32 (%p74_p3), %s187_s26, 7 }
   0xe   : > { %s799_s6 = scalar_lea.vmem (%p74_p3), %s850_s2, %s657_s27  ;;  %s189_s7 = scalar_lea.vmem (%p74_p3), [#allocation2], %s630_s28 }
   0xf   : > { %v251_v0 = vld [vmem:[%s799_s6] sm:$0xff] (%p74_p3)  ;;  %v253_v1 = vld [vmem:[%s799_s6 + $0x10] sm:$0xff] (%p74_p3) }
  0x10   : > { %v255_v2 = vld [vmem:[%s799_s6 + $0x20] sm:$0xff] (%p74_p3)  ;;  %252 = vst [vmem:[%s189_s7] sm:$0xff] (%p74_p3), %v251_v0  ;;  %254 = vst [vmem:[%s189_s7 + $0x8] sm:$0xff] (%p74_p3), %v253_v1  ;;  %v257_v3 = vld [vmem:[%s799_s6 + $0x30] sm:$0xff] (%p74_p3) }
  0x11   : > { %256 = vst [vmem:[%s189_s7 + $0x10] sm:$0xff] %v255_v2  ;;  %v259_v4 = vld [vmem:[%s799_s6 + $0x40] sm:$0xff]  ;;  %v261_v5 = vld [vmem:[%s799_s6 + $0x50] sm:$0xff]  ;;  %258 = vst [vmem:[%s189_s7 + $0x18] sm:$0xff] %v257_v3 }
  0x12   : > { %260 = vst [vmem:[%s189_s7 + $0x20] sm:$0xff] %v259_v4  ;;  %262 = vst [vmem:[%s189_s7 + $0x28] sm:$0xff] %v261_v5  ;;  %v263_v6 = vld [vmem:[%s799_s6 + $0x60] sm:$0xff]  ;;  %v265_v7 = vld [vmem:[%s799_s6 + $0x70] sm:$0xff] }
  0x13   : > { %v267_v8 = vld [vmem:[%s799_s6 + $0x80] sm:$0xff]  ;;  %264 = vst [vmem:[%s189_s7 + $0x30] sm:$0xff] %v263_v6  ;;  %266 = vst [vmem:[%s189_s7 + $0x38] sm:$0xff] %v265_v7  ;;  %v269_v9 = vld [vmem:[%s799_s6 + $0x90] sm:$0xff] }
  0x14   : > { %268 = vst [vmem:[%s189_s7 + $0x40] sm:$0xff] %v267_v8  ;;  %v271_v10 = vld [vmem:[%s799_s6 + $0xa0] sm:$0xff]  ;;  %v273_v11 = vld [vmem:[%s799_s6 + $0xb0] sm:$0xff]  ;;  %270 = vst [vmem:[%s189_s7 + $0x48] sm:$0xff] %v269_v9 }
  0x15   : > { %272 = vst [vmem:[%s189_s7 + $0x50] sm:$0xff] %v271_v10  ;;  %274 = vst [vmem:[%s189_s7 + $0x58] sm:$0xff] %v273_v11  ;;  %v275_v12 = vld [vmem:[%s799_s6 + $0xc0] sm:$0xff]  ;;  %v277_v13 = vld [vmem:[%s799_s6 + $0xd0] sm:$0xff] }
  0x16   : > { %v279_v14 = vld [vmem:[%s799_s6 + $0xe0] sm:$0xff]  ;;  %276 = vst [vmem:[%s189_s7 + $0x60] sm:$0xff] %v275_v12  ;;  %278 = vst [vmem:[%s189_s7 + $0x68] sm:$0xff] %v277_v13  ;;  %v281_v15 = vld [vmem:[%s799_s6 + $0xf0] sm:$0xff] }
  0x17   : > { %280 = vst [vmem:[%s189_s7 + $0x70] sm:$0xff] %v279_v14  ;;  %282 = vst [vmem:[%s189_s7 + $0x78] sm:$0xff] %v281_v15 }
  0x18 PF: > { %p633_p5 = scmp.ge.s32.totalorder %s730_s20, 1  ;;  %p287_p6 = scmp.lt.s32.totalorder %s730_s20, 3 }
  0x1a   : > { %p288_p7 = pnand %p633_p5, %p287_p6 }
  0x1b   : > { %s294_s8 = sand.u32 (!%p288_p7), 1, %s722_s18   ;;  %s635_s15 = sshll.u32 (!%p288_p7), %s779_s21, 1 }
  0x1c   : > { %291 = sbr.rel (%p288_p7) target bundleno = 407 (0x197), region = 66  ;;  %s634_s11 = sshll.u32 (!%p288_p7), %s294_s8, 7 }
  0x1d   : > { %s296_s12 = scalar_lea.vmem (!%p288_p7), [#allocation2], %s634_s11  ;;  %p331_p8 = scmp.lt.s32.totalorder (!%p288_p7), %s635_s15, 3 }
  0x1e   : > { %p336_p9 = scmp.lt.s32.totalorder (!%p288_p7), %s779_s21, 1 }
  0x21   : > { %v362_v16 = vld [vmem:[%s849_s1] sm:$0xff]  ;;  %v732_v17 = vmov 0   ;;  %v684_v18 = vld [vmem:[%s296_s12 + $0x74] ss:$8 sps:$4 sm:$0xff]   ;;  %v686_v19 = vld [vmem:[%s296_s12 + $0x70] ss:$8 sps:$4 sm:$0xff]  }
  0x22   : > { %480 = vmatprep.mubr.bf16.mxu0 %v732_v17  ;;  %683 = vset.pattern.permute.xlu0 %v732_v17  ;;  %v687_v20 = vld [vmem:[%s296_s12 + $0x64] ss:$8 sps:$4 sm:$0xff]   ;;  %v689_v21 = vld [vmem:[%s296_s12 + $0x60] ss:$8 sps:$4 sm:$0xff]   ;;  %v690_v22 = vld [vmem:[%s296_s12 + $0x54] ss:$8 sps:$4 sm:$0xff]  }
  0x23   : > { %365 = vperm.xlu0 %683, %v362_v16   ;;  %448 = vmatprep.subr.bf16.mxu0 %v684_v18  ;;  %v692_v23 = vld [vmem:[%s296_s12 + $0x50] ss:$8 sps:$4 sm:$0xff]   ;;  %v693_v24 = vld [vmem:[%s296_s12 + $0x44] ss:$8 sps:$4 sm:$0xff]   ;;  %v695_v25 = vld [vmem:[%s296_s12 + $0x40] ss:$8 sps:$4 sm:$0xff]  }
  0x24   : > { %449 = vmatpush1.bf16.msra.mxu0 %v686_v19  ;;  %v696_v26 = vld [vmem:[%s296_s12 + $0x34] ss:$8 sps:$4 sm:$0xff]   ;;  %v698_v27 = vld [vmem:[%s296_s12 + $0x30] ss:$8 sps:$4 sm:$0xff]   ;;  %v699_v28 = vld [vmem:[%s296_s12 + $0x24] ss:$8 sps:$4 sm:$0xff]  }
  0x25   : > { %450 = vmatprep.subr.bf16.mxu0 %v687_v20  ;;  %v701_v29 = vld [vmem:[%s296_s12 + $0x20] ss:$8 sps:$4 sm:$0xff]   ;;  %v702_v30 = vld [vmem:[%s296_s12 + $0x14] ss:$8 sps:$4 sm:$0xff]   ;;  %v704_v31 = vld [vmem:[%s296_s12 + $0x10] ss:$8 sps:$4 sm:$0xff]  }
  0x26   : > { %v705_v32 = vld [vmem:[%s296_s12 + $0x4] ss:$8 sps:$4 sm:$0xff]   ;;  %v707_v33 = vld [vmem:[%s296_s12] ss:$8 sps:$4 sm:$0xff]   ;;  %s858_s15 = smov (!%p331_p8, %s635_s15), 3  ;;  %s860_s21 = smov (!%p336_p9, %s779_s21), 1 }
  0x27   : > { %v345_v34 = vld [vmem:[%s848_s0] sm:$0xf]  ;;  %s636_s16 = sshll.u32 %s858_s15, 3  ;;  %s637_s23 = sshll.u32 %s860_s21, 3  ;;  %vm494_vm0 = vcmask 7168  }
  0x28   : > { %451 = vmatpush1.bf16.msra.mxu0 %v689_v21  ;;  %s334_s20 = scalar_lea.vmem %s851_s3, %s636_s16  ;;  %s339_s27 = scalar_lea.vmem %s852_s4, %s637_s23 }
  0x29   : > { %452 = vmatprep.subr.bf16.mxu0 %v690_v22  ;;  %s343_s30 = scalar_lea.vmem %s853_s5, %s637_s23 }
  0x2c   : > { %453 = vmatpush1.bf16.msra.mxu0 %v692_v23 }
  0x2d   : > { %454 = vmatprep.subr.bf16.mxu0 %v693_v24 }
  0x30   : > { %455 = vmatpush1.bf16.msra.mxu0 %v695_v25 }
  0x31   : > { %456 = vmatprep.subr.bf16.mxu0 %v696_v26 }
  0x34   : > { %457 = vmatpush1.bf16.msra.mxu0 %v698_v27 }
  0x35   : > { %458 = vmatprep.subr.bf16.mxu0 %v699_v28 }
  0x38   : > { %459 = vmatpush1.bf16.msra.mxu0 %v701_v29 }
  0x39   : > { %460 = vmatprep.subr.bf16.mxu0 %v702_v30 }
  0x3c   : > { %461 = vmatpush1.bf16.msra.mxu0 %v704_v31 }
  0x3d   : > { %462 = vmatprep.subr.bf16.mxu0 %v705_v32 }
  0x40   : > { %463 = vmatpush1.bf16.msra.mxu0 %v707_v33 }
  0x43   : > { %481 = vmatmul.mubr.bf16.vlgmr.msra.gmra.mxu0 %v345_v34 }
  0x9e   : > { %v366_v35 = vpop.permute.xlu0 %365 }
 0x103   : > { %v482_v36 = vpop.f32.mrf.mxu0 }
 0x104   : > { %v483_v37 = vadd.f32 %v482_v36, %v366_v35 }
 0x105   : > { %v484_v38 = vpop.f32.mrf.mxu0 }
 0x106   : > { %489 = vst [vmem:[%s334_s20] sm:$0xff] %v483_v37  ;;  %v485_v39 = vadd.f32 %v484_v38, %v366_v35  ;;  %v496_v42 = vmul.f32 %v483_v37, %v483_v37 }
 0x107   : > { %v486_v40 = vpop.f32.mrf.mxu0 }
 0x108   : > { %490 = vst [vmem:[%s334_s20 + $0x8] sm:$0xff] %v485_v39  ;;  %v491_v41 = vadd.f32 %v485_v39, %v483_v37  ;;  %v497_v43 = vmul.f32 %v485_v39, %v485_v39 }
 0x109   : > { %v487_v44 = vpop.f32.mrf.mxu0 }
 0x10a   : > { %492 = vadd.xlane.f32.xlu0 %v491_v41  ;;  %v498_v45 = vadd.f32 %v497_v43, %v496_v42 }
 0x10c   : > { %499 = vadd.xlane.f32.xlu1 %v498_v45 }
 0x193   : > { %v493_v46 = vpop.xlane.xlu0 %492 }
 0x194   : > { %495 = vst.msk [vmem:[%s339_s27] sm:$0xff] %vm494_vm0, %v493_v46 }
 0x195   : > { %v500_v47 = vpop.xlane.xlu1 %499 }
 0x196   : > { %501 = vst.msk [vmem:[%s343_s30] sm:$0xff] %vm494_vm0, %v500_v47 }
 0x197 PF: > { %p13_p10 = scmp.ge.s32.totalorder %s782_s22, 4   ;;  %s854_s18 = smov %s726_s19 }
 0x198   : > { %s855_s19 = smov %s791_s25  ;;  %s856_s20 = smov %s782_s22 }
 0x199   :  { %15 = sbr.rel (!%p13_p10) target bundleno = 2 (0x2), region = 129 }

</bundles_post_ra>
